<compile_context>
chip_gen: v7x
topology: tpu7x:2x2x1
jax: 0.10.0
libtpu: 0.0.40
codegen_flags: <defaults>
</compile_context>

<pallas_src>
import functools

import jax
import jax.numpy as jnp
from jax.experimental import pallas as pl
from jax.experimental.pallas import tpu as pltpu

_TINY_TOTAL_BYTES = 2 * 1024 * 1024        # whole batch below this => one step
_MIB = 1024 * 1024


# ---------------------------------------------------------------------------
# Generation-aware limits
# ---------------------------------------------------------------------------

@functools.lru_cache(maxsize=1)
def _tpu_limits():
    """(vmem_limit_bytes, two_tensorcores) derived from the attached chip."""
    phys = 128 * _MIB                       # v5e/v6e physical VMEM per core
    try:
        info = pltpu.get_tpu_info()
        phys = int(getattr(info, "vmem_capacity_bytes", phys)) or phys
    except Exception:
        pass
    # ~3/4 of physical, capped: v5e/v6e -> 96 MiB, v7x (64 MiB phys) -> 48 MiB.
    vmem_limit = max(32 * _MIB, min((phys * 3) // 4, 100 * _MIB))
    # v7x marker: 64 MiB VMEM per TensorCore, 2 TensorCores per chip.
    two_cores = phys <= 64 * _MIB
    return vmem_limit, two_cores


# ---------------------------------------------------------------------------
# Kernels
# ---------------------------------------------------------------------------

def _se_fused_kernel(x_ref, w1_ref, w2_ref, o_ref, *, inv_hw):
    """Whole-sample SE: squeeze + excitation + scale in a single pass.

    x_ref/o_ref: (Bt, C, HW); w1_ref: (C, Cr); w2_ref: (Cr, C).
    """
    # Squeeze: global average pool over the spatial (lane) axis, f32 accum.
    # The f32 upcast's live range ends at this reduce (x is re-read below).
    y = jnp.sum(x_ref[...].astype(jnp.float32), axis=-1) * inv_hw       # (Bt, C)
    # Excitation: FC -> ReLU -> FC -> Sigmoid, batched over Bt, f32 accum/EUP.
    h = jnp.dot(y, w1_ref[...].astype(jnp.float32),
                preferred_element_type=jnp.float32)                     # (Bt, Cr)
    h = jnp.maximum(h, 0.0)
    s = jnp.dot(h, w2_ref[...].astype(jnp.float32),
                preferred_element_type=jnp.float32)                     # (Bt, C)
    s = jax.nn.sigmoid(s)                                               # f32 gate
    # Scale: re-read x from VMEM and multiply in the activation dtype (the
    # per-channel gate is cast down instead of upcasting the whole block).
    gate = s.astype(o_ref.dtype)[:, :, None]                            # (Bt, C, 1)
    o_ref[...] = (x_ref[...] * gate).astype(o_ref.dtype)


def _se_pool_kernel(x_ref, sum_ref, *, inv_hw):
    """Tiled global average pool with HW accumulation.

    x_ref: (1, Ct, Ht); sum_ref: (1, Ct) f32, resident across the HW axis.
    """
    @pl.when(pl.program_id(2) == 0)
    def _init():
        sum_ref[...] = jnp.zeros_like(sum_ref)

    sum_ref[...] += jnp.sum(x_ref[...].astype(jnp.float32), axis=-1)

    @pl.when(pl.program_id(2) == pl.num_programs(2) - 1)
    def _finalize():
        sum_ref[...] = sum_ref[...] * inv_hw


def _se_scale_kernel(x_ref, s_ref, o_ref):
    """Tiled channel-wise scaling.  x_ref/o_ref: (1, Ct, Ht); s_ref: (1, Ct)."""
    gate = s_ref[...].astype(o_ref.dtype)[:, :, None]                   # (1, Ct, 1)
    o_ref[...] = (x_ref[...] * gate).astype(o_ref.dtype)


# ---------------------------------------------------------------------------
# Tiling heuristics (static, run at trace time)
# ---------------------------------------------------------------------------

def _pick_batch_tile(batch, sample_bytes, target_bytes, min_steps):
    """Largest divisor bt of batch with bt*sample_bytes <= target and
    (when min_steps > 1, i.e. dual-TC chips) at least min_steps grid steps."""
    best = 1
    for bt in range(1, batch + 1):
        if batch % bt:
            continue
        if bt * sample_bytes > target_bytes:
            break
        if min_steps > 1 and batch // bt < min_steps:
            break
        best = bt
    return best


def _pick_fallback_tiles(channels, hw, itemsize, target_bytes):
    """(ct, ht) for the streaming fallback.

    Prefers ct == channels (lane-dense (B, C) pooled mean / gate) with a
    lane-dense (multiple of 128 or full) HW tile; otherwise tiles channels in
    multiples of 8.  Never returns a block larger than the budget if a fitting
    tile exists.
    """
    limit = max(1, target_bytes // itemsize)          # elements per x block

    def hw_tile(ct):
        cap = limit // ct
        if cap <= 0:
            return None
        if hw <= cap:
            return hw                                 # full extent, always legal
        best = None
        for d in range(128, cap + 1, 128):            # lane-dense divisors only
            if hw % d == 0:
                best = d
        return best

    cands = [channels]
    cands += sorted((d for d in range(8, channels, 8) if channels % d == 0),
                    reverse=True)
    if channels % 8 != 0:
        cands += sorted((d for d in range(1, channels) if channels % d == 0),
                        reverse=True)
    for ct in cands:
        ht = hw_tile(ct)
        if ht is not None:
            return ct, ht
    return channels, hw                               # nothing fits: stream rows


# ---------------------------------------------------------------------------
# Wrapper
# ---------------------------------------------------------------------------

def _se_layer_impl(x, w1, w2, *, target_block_bytes=None, alias=False):
    """SELayer forward.  x: (B, C, H, W); w1: (C, C//r); w2: (C//r, C)."""
    B, C, H, W = x.shape
    HW = H * W
    Cr = w1.shape[1]
    inv_hw = 1.0 / float(HW)
    itemsize = x.dtype.itemsize
    sample_bytes = C * HW * itemsize

    vmem_limit, two_cores = _tpu_limits()
    # in + out double-buffered (4x block) + VMEM-resident weights must fit.
    w_bytes = 2 * (w1.size * w1.dtype.itemsize + w2.size * w2.dtype.itemsize)
    if target_block_bytes is None:
        target_block_bytes = max(1 * _MIB, (vmem_limit - w_bytes) // 5)

    xr = x.reshape(B, C, HW)          # free row-major reshape (no data movement)
    alias_map = {0: 0} if alias else {}

    def cparams(sem):
        return pltpu.CompilerParams(dimension_semantics=sem,
                                    vmem_limit_bytes=vmem_limit)

    if sample_bytes <= target_block_bytes:
        # ---- Fast path: one fused pass, whole samples per grid step. ----
        total_bytes = B * sample_bytes
        if two_cores and B >= 2 and total_bytes > _TINY_TOTAL_BYTES:
            # v7x: keep both TensorCores busy and let the pipeline fill.
            min_steps = min(4, B)
        else:
            # Single-TC v5e/v6e (or tiny layers): largest tile that fits.
            min_steps = 1
        bt = _pick_batch_tile(B, sample_bytes, target_block_bytes, min_steps)
        # NOTE: on v7x, pltpu.CORE_PARALLEL on the batch axis could be used for
        # explicit TC sharding; plain "parallel" is kept here for portability.
        out = pl.pallas_call(
            functools.partial(_se_fused_kernel, inv_hw=inv_hw),
            out_shape=jax.ShapeDtypeStruct((B, C, HW), x.dtype),
            grid=(B // bt,),
            in_specs=[
                pl.BlockSpec((bt, C, HW), lambda b: (b, 0, 0)),
                # Constant index maps: weights stay VMEM-resident, no re-DMA.
                pl.BlockSpec((C, Cr), lambda b: (0, 0)),
                pl.BlockSpec((Cr, C), lambda b: (0, 0)),
            ],
            out_specs=pl.BlockSpec((bt, C, HW), lambda b: (b, 0, 0)),
            input_output_aliases=alias_map,
            compiler_params=cparams(("parallel",)),
        )(xr, w1, w2)
    else:
        # ---- Fallback for very large activations: two streaming passes,
        # tiled over channels AND spatial, FCs once per batch in between.
        ct, ht = _pick_fallback_tiles(C, HW, itemsize, target_block_bytes)
        grid = (B, C // ct, HW // ht)
        # Pass 1: tiled global average pool -> lane-dense (B, C) f32 means.
        means = pl.pallas_call(
            functools.partial(_se_pool_kernel, inv_hw=inv_hw),
            out_shape=jax.ShapeDtypeStruct((B, C), jnp.float32),
            grid=grid,
            in_specs=[pl.BlockSpec((1, ct, ht), lambda b, c, s: (b, c, s))],
            out_specs=pl.BlockSpec((1, ct), lambda b, c, s: (b, c)),
            compiler_params=cparams(("parallel", "parallel", "arbitrary")),
        )(xr)
        # Tiny excitation FCs done ONCE per batch, outside the streaming loop.
        h = jnp.maximum(
            jnp.dot(means, w1.astype(jnp.float32),
                    preferred_element_type=jnp.float32), 0.0)            # (B, Cr)
        gate = jax.nn.sigmoid(
            jnp.dot(h, w2.astype(jnp.float32),
                    preferred_element_type=jnp.float32))                 # (B, C)
        gate = gate.astype(x.dtype)        # multiply in the activation dtype
        # Pass 2: tiled channel-wise scaling streamed over x.
        out = pl.pallas_call(
            _se_scale_kernel,
            out_shape=jax.ShapeDtypeStruct((B, C, HW), x.dtype),
            grid=grid,
            in_specs=[
                pl.BlockSpec((1, ct, ht), lambda b, c, s: (b, c, s)),
                pl.BlockSpec((1, ct), lambda b, c, s: (b, c)),
            ],
            out_specs=pl.BlockSpec((1, ct, ht), lambda b, c, s: (b, c, s)),
            input_output_aliases=alias_map,
            compiler_params=cparams(("parallel", "parallel", "parallel")),
        )(xr, gate)

    return out.reshape(B, C, H, W)


# Public entry points.
#  * se_layer: allocates a fresh output (no aliasing => no defensive copy).
#  * se_layer_inplace: donates x and aliases it to the output (true in-place
#    gating); the caller must not reuse x afterwards.
_se_layer_jit = jax.jit(
    functools.partial(_se_layer_impl, alias=False),
    static_argnames=("target_block_bytes",))
_se_layer_inplace_jit = jax.jit(
    functools.partial(_se_layer_impl, alias=True),
    static_argnames=("target_block_bytes",),
    donate_argnums=(0,))


def se_layer(x, w1, w2, *, target_block_bytes=None):
    return _se_layer_jit(x, w1, w2, target_block_bytes=target_block_bytes)


def se_layer_inplace(x, w1, w2, *, target_block_bytes=None):
    return _se_layer_inplace_jit(x, w1, w2, target_block_bytes=target_block_bytes)


def se_layer_ref(x, w1, w2):
    """Pure-JAX reference matching the PyTorch forward."""
    y = jnp.mean(x, axis=(2, 3))                  # (B, C)  adaptive avg pool
    h = jnp.maximum(y @ w1, 0.0)                  # (B, C//r)
    s = jax.nn.sigmoid(h @ w2)                    # (B, C)
    return x * s[:, :, None, None]


if __name__ == "__main__":
    B, C, H, W = 2, 64, 16, 16        # HW = 256: lane-dense (multiple of 128)
    reduction = 16
    Cr = C // reduction

    key = jax.random.PRNGKey(0)
    kx, k1, k2 = jax.random.split(key, 3)
    x = jax.random.normal(kx, (B, C, H, W), dtype=jnp.float32)
    # nn.Linear weights (bias-free), pre-transposed so y @ w == y @ W.T.
    w1 = 0.1 * jax.random.normal(k1, (C, Cr), dtype=jnp.float32)
    w2 = 0.1 * jax.random.normal(k2, (Cr, C), dtype=jnp.float32)

    ref = se_layer_ref(x, w1, w2)

    # Fast path: fused single-pass kernel.
    out = jax.block_until_ready(se_layer(x, w1, w2))
    assert out.shape == (B, C, H, W)
    assert jnp.allclose(out, ref, atol=1e-5, rtol=1e-5), "fused path mismatch"

    # Force the large-activation fallback (two tiled streaming passes):
    # 32 KiB target => (1, C, 128) blocks, HW accumulation axis exercised.
    out_fb = jax.block_until_ready(
        se_layer(x, w1, w2, target_block_bytes=32 * 1024))
    assert jnp.allclose(out_fb, ref, atol=1e-5, rtol=1e-5), "tiled path mismatch"

    # bf16 activations: halves HBM traffic; pooling/FCs/sigmoid stay in f32,
    # only the final gate multiply + store run in bf16.
    xb = x.astype(jnp.bfloat16)
    out_bf = jax.block_until_ready(se_layer(xb, w1, w2))
    ref_bf = se_layer_ref(xb.astype(jnp.float32), w1, w2)
    assert out_bf.dtype == jnp.bfloat16
    assert jnp.allclose(out_bf.astype(jnp.float32), ref_bf,
                        atol=5e-2, rtol=5e-2), "bf16 path mismatch"

    # In-place variant: x is donated at the jit boundary and aliased to the
    # output, so the gating really happens in place (no defensive copy).
    x_dup = jnp.copy(x)
    out_ip = jax.block_until_ready(se_layer_inplace(x_dup, w1, w2))
    assert jnp.allclose(out_ip, ref, atol=1e-5, rtol=1e-5), "in-place mismatch"

    print("KERNEL_OK")
</pallas_src>

<mosaic_0001>
module attributes {stable_mosaic.version = 11 : i64} {
  func.func @_se_fused_kernel(%arg0: i32, %arg1: memref<2x64x256xf32, #tpu.memory_space<vmem>>, %arg2: memref<64x4xf32, #tpu.memory_space<vmem>>, %arg3: memref<4x64xf32, #tpu.memory_space<vmem>>, %arg4: memref<2x64x256xf32, #tpu.memory_space<vmem>>) attributes {dimension_semantics = [#tpu.dimension_semantics<parallel>], iteration_bounds = array<i64: 1>, scalar_prefetch = 0 : i64, scratch_operands = 0 : i64, tpu.core_type = #tpu.core_type<tc>, window_params = [{transform_indices = @transform_0, window_bounds = array<i64: 2, 64, 256>}, {pipeline_mode = #tpu.pipeline_mode<synchronous>, transform_indices = @transform_1, window_bounds = array<i64: 64, 4>}, {pipeline_mode = #tpu.pipeline_mode<synchronous>, transform_indices = @transform_2, window_bounds = array<i64: 4, 64>}, {transform_indices = @transform_3, window_bounds = array<i64: 2, 64, 256>}]} {
    %c0 = arith.constant 0 : index
    %c0_0 = arith.constant 0 : index
    %c0_1 = arith.constant 0 : index
    %0 = vector.load %arg1[%c0, %c0_0, %c0_1] : memref<2x64x256xf32, #tpu.memory_space<vmem>>, vector<2x64x256xf32>
    %cst = arith.constant dense<0.000000e+00> : vector<2x64xf32>
    %1 = vector.multi_reduction <add>, %0, %cst [2] : vector<2x64x256xf32> to vector<2x64xf32>
    %cst_2 = arith.constant 3.906250e-03 : f32
    %2 = vector.broadcast %cst_2 : f32 to vector<2x64xf32>
    %3 = arith.mulf %1, %2 : vector<2x64xf32>
    %c0_3 = arith.constant 0 : index
    %c0_4 = arith.constant 0 : index
    %4 = vector.load %arg2[%c0_3, %c0_4] : memref<64x4xf32, #tpu.memory_space<vmem>>, vector<64x4xf32>
    %cst_5 = arith.constant dense<0.000000e+00> : vector<2x4xf32>
    %5 = tpu.matmul %3, %4, %cst_5 {dimension_numbers = #tpu.dot_dimension_numbers<[1], [0], [0], [1], [0, 0, 1, 1], [], []>} : vector<2x64xf32>, vector<64x4xf32>, vector<2x4xf32> -> vector<2x4xf32>
    %cst_6 = arith.constant 0.000000e+00 : f32
    %6 = vector.broadcast %cst_6 : f32 to vector<2x4xf32>
    %7 = arith.maximumf %5, %6 : vector<2x4xf32>
    %c0_7 = arith.constant 0 : index
    %c0_8 = arith.constant 0 : index
    %8 = vector.load %arg3[%c0_7, %c0_8] : memref<4x64xf32, #tpu.memory_space<vmem>>, vector<4x64xf32>
    %cst_9 = arith.constant dense<0.000000e+00> : vector<2x64xf32>
    %9 = tpu.matmul %7, %8, %cst_9 {dimension_numbers = #tpu.dot_dimension_numbers<[1], [0], [0], [1], [0, 0, 1, 1], [], []>} : vector<2x4xf32>, vector<4x64xf32>, vector<2x64xf32> -> vector<2x64xf32>
    %10 = arith.negf %9 : vector<2x64xf32>
    %11 = math.exp %10 : vector<2x64xf32>
    %cst_10 = arith.constant 1.000000e+00 : f32
    %12 = vector.broadcast %cst_10 : f32 to vector<2x64xf32>
    %13 = arith.addf %12, %11 : vector<2x64xf32>
    %14 = arith.divf %12, %13 : vector<2x64xf32>
    %15 = vector.shape_cast %14 : vector<2x64xf32> to vector<2x64x1xf32>
    %c0_11 = arith.constant 0 : index
    %c0_12 = arith.constant 0 : index
    %c0_13 = arith.constant 0 : index
    %16 = vector.load %arg1[%c0_11, %c0_12, %c0_13] : memref<2x64x256xf32, #tpu.memory_space<vmem>>, vector<2x64x256xf32>
    %17 = vector.broadcast %15 : vector<2x64x1xf32> to vector<2x64x256xf32>
    %18 = arith.mulf %16, %17 : vector<2x64x256xf32>
    %c0_14 = arith.constant 0 : index
    %c0_15 = arith.constant 0 : index
    %c0_16 = arith.constant 0 : index
    %19 = vector.load %arg4[%c0_14, %c0_15, %c0_16] : memref<2x64x256xf32, #tpu.memory_space<vmem>>, vector<2x64x256xf32>
    tpu.vector_store %arg4[%c0_14, %c0_15, %c0_16], %18 {strides = array<i32>} : memref<2x64x256xf32, #tpu.memory_space<vmem>>, vector<2x64x256xf32>,
    return
  }
  func.func @transform_0(%arg0: i32) -> (i32, i32, i32) {
    %c0_i32 = arith.constant 0 : i32
    %c0_i32_0 = arith.constant 0 : i32
    %c0_i32_1 = arith.constant 0 : i32
    return %arg0, %c0_i32, %c0_i32_0 : i32, i32, i32
  }
  func.func @transform_1(%arg0: i32) -> (i32, i32) {
    %c0_i32 = arith.constant 0 : i32
    %c0_i32_0 = arith.constant 0 : i32
    %c0_i32_1 = arith.constant 0 : i32
    return %c0_i32, %c0_i32_0 : i32, i32
  }
  func.func @transform_2(%arg0: i32) -> (i32, i32) {
    %c0_i32 = arith.constant 0 : i32
    %c0_i32_0 = arith.constant 0 : i32
    %c0_i32_1 = arith.constant 0 : i32
    return %c0_i32, %c0_i32_0 : i32, i32
  }
  func.func @transform_3(%arg0: i32) -> (i32, i32, i32) {
    %c0_i32 = arith.constant 0 : i32
    %c0_i32_0 = arith.constant 0 : i32
    %c0_i32_1 = arith.constant 0 : i32
    return %arg0, %c0_i32, %c0_i32_0 : i32, i32, i32
  }
}

</mosaic_0001>

<bundles_post_ra>
// kernel: _se_layer_impl.1
= control target key start
LH: loop header
LB: loop body
LE: loop exit
PB: predicated region body
PF: predicated region fallthrough
CT: control target
= control target key end

     0   :  { %8 = vsyncpa [#allocation3], 0  ;;  %s978_s0 = inlined_call_operand.hbm [shape: f32[2,64,256], index: 0, kind: input, shape index: {}]   ;;  %s979_s1 = inlined_call_operand.hbm [shape: f32[64,4], index: 1, kind: input, shape index: {}]   ;;  %s980_s2 = inlined_call_operand.hbm [shape: f32[4,64], index: 2, kind: input, shape index: {}]   ;;  %s981_s3 = inlined_call_operand.hbm [shape: f32[2,64,256], index: 3, kind: output, shape index: {}]  }
   0x1   :  { %9 = vsyncpa [#allocation6], 0 }
   0x2   :  { %10 = vsyncpa [#allocation4], 0  ;;  %s741_s12 = smov [#allocation5]   ;;  %s647_s16 = scalar_lea.hbm %s979_s1, 1024 }
   0x3   :  { %s28_s13 = sshll.u32 %s741_s12, 4  ;;  %p648_p0 = scmp.ne.s32.totalorder %s979_s1, %s647_s16  ;;  %s29_s13 = int_to_ptr.vmem [resolvable:$true] %s28_s13 }
   0x4   :  { %p651_p1 = scmp.lt.u32.totalorder %s647_s16, %s979_s1 }
   0x6   :  { %p653_p2 = pnand %p651_p1, %p648_p0 }
   0x8   :  { %656 = shalt.err (!%p653_p2)
}
   0x9   :  { %s657_s21 = scalar_lea.vmem %s29_s13, 1024  ;;  %p662_p4 = scmp.lt.s32.totalorder %s29_s13, %s29_s13 }
   0xa   :  { %p658_p3 = scmp.ne.s32.totalorder %s29_s13, %s657_s21  ;;  %p663_p5 = scmp.lt.s32.totalorder %s657_s21, %s657_s21 }
   0xc   :  { %p664_p6 = por %p663_p5, %p662_p4 }
   0xe   :  { %p665_p7 = pnand %p664_p6, %p658_p3 }
  0x10   :  { %668 = shalt.err (!%p665_p7)
}
  0x11   :  { %s742_s22 = smov 128   ;;  %s743_s23 = smov 8  }
  0x12   :  { %34 = dma.hbm_to_vmem [thread:$0]  %s979_s1, 1024, %s29_s13, [#allocation6], %s742_s22, %s742_s22, %s743_s23  }
  0x13   :  { %s744_s26 = smov [#allocation2]   ;;  %s669_s30 = scalar_lea.hbm %s978_s0, 4096 }
  0x14   :  { %s16_s27 = sshll.u32 %s744_s26, 4  ;;  %p670_p8 = scmp.ne.s32.totalorder %s978_s0, %s669_s30  ;;  %s17_s27 = int_to_ptr.vmem [resolvable:$true] %s16_s27 }
  0x15   :  { %p673_p9 = scmp.lt.u32.totalorder %s669_s30, %s978_s0 }
  0x17   :  { %p675_p10 = pnand %p673_p9, %p670_p8 }
  0x19   :  { %678 = shalt.err (!%p675_p10)
}
  0x1a   :  { %s679_s8 = scalar_lea.vmem %s17_s27, 4096  ;;  %p684_p12 = scmp.lt.s32.totalorder %s17_s27, %s17_s27 }
  0x1b   :  { %p680_p11 = scmp.ne.s32.totalorder %s17_s27, %s679_s8  ;;  %p685_p13 = scmp.lt.s32.totalorder %s679_s8, %s679_s8 }
  0x1d   :  { %p686_p0 = por %p685_p13, %p684_p12 }
  0x1f   :  { %p687_p1 = pnand %p686_p0, %p680_p11 }
  0x21   :  { %690 = shalt.err (!%p687_p1)
}
  0x22   :  { %s745_s1 = smov 256   ;;  %s746_s9 = smov 16  }
  0x23   :  { %22 = dma.hbm_to_vmem [thread:$0]  %s978_s0, 4096, %s17_s27, [#allocation3], %s745_s1, %s745_s1, %s746_s9  }
  0x24   :  { %s747_s12 = smov [#allocation7]   ;;  %s691_s16 = scalar_lea.hbm %s980_s2, 64 }
  0x25   :  { %s41_s13 = sshll.u32 %s747_s12, 4  ;;  %p692_p2 = scmp.ne.s32.totalorder %s980_s2, %s691_s16  ;;  %s42_s13 = int_to_ptr.vmem [resolvable:$true] %s41_s13 }
  0x26   :  { %p695_p3 = scmp.lt.u32.totalorder %s691_s16, %s980_s2 }
  0x28   :  { %p697_p4 = pnand %p695_p3, %p692_p2 }
  0x2a   :  { %700 = shalt.err (!%p697_p4)
}
  0x2b   :  { %s701_s21 = scalar_lea.vmem %s42_s13, 64  ;;  %p706_p6 = scmp.lt.s32.totalorder %s42_s13, %s42_s13 }
  0x2c   :  { %p702_p5 = scmp.ne.s32.totalorder %s42_s13, %s701_s21  ;;  %p707_p7 = scmp.lt.s32.totalorder %s701_s21, %s701_s21 }
  0x2e   :  { %p708_p8 = por %p707_p7, %p706_p6 }
  0x30   :  { %p709_p9 = pnand %p708_p8, %p702_p5 }
  0x32   :  { %712 = shalt.err (!%p709_p9)
}
  0x33   :  { %44 = dma.hbm_to_vmem [thread:$0]  %s980_s2, 64, %s42_s13, [#allocation6]  }
  0x34   :  { %735 = dma.done.wait [#allocation3], 4096  }
  0x35   :  { %736 = vsyncadd [#allocation3], 4294963200 }
  0x36   :  { %737 = dma.done.wait [#allocation6], 1088  }
  0x37   :  { %738 = vsyncadd [#allocation6], 4294966208  ;;  %v811_v0 = vld [vmem:[#allocation2 + $0x80] sm:$0xff]  ;;  %v813_v1 = vld [vmem:[#allocation2 + $0x88] sm:$0xff]  ;;  %v748_v51 = vmov 0.0|0.0   ;;  %vm749_vm0 = vmmov 0  }
  0x38   :  { %v815_v2 = vld [vmem:[#allocation2] sm:$0xff]  ;;  %v110_v3 = vadd.f32 %v813_v1, %v811_v0  ;;  %v819_v4 = vld [vmem:[#allocation2 + $0x8] sm:$0xff]  ;;  %v821_v5 = vld [vmem:[#allocation2 + $0x90] sm:$0xff]  ;;  %620 = vmatprep.subr.bf16.mxu0 %v748_v51  ;;  %v750_v61 = vmov 0.0   ;;  %vm185_vm1 = vcmask 130112   ;;  %vm192_vm2 = vcmask 195712  }
  0x39   :  { %v823_v6 = vld [vmem:[#allocation2 + $0x98] sm:$0xff]  ;;  %v86_v7 = vadd.f32 %v819_v4, %v815_v2  ;;  %v827_v8 = vld [vmem:[#allocation2 + $0x10] sm:$0xff]  ;;  %v835_v12 = vld [vmem:[#allocation2 + $0xa0] sm:$0xff]  ;;  %612 = vmatprep.mubr.msk.f32.mxu0 %vm749_vm0, %v750_v61  ;;  %615 = vmatprep.subr.mxu1 %v750_v61  ;;  %vm199_vm3 = vcmask 261312   ;;  %vm206_vm4 = vcmask 326912   ;;  %vm213_vm5 = vcmask 392512  }
  0x3a   :  { %v829_v9 = vld [vmem:[#allocation2 + $0x18] sm:$0xff]  ;;  %111 = vadd.xlane.f32.xlu1 %v110_v3  ;;  %v113_v10 = vadd.f32 %v823_v6, %v821_v5  ;;  %v837_v13 = vld [vmem:[#allocation2 + $0xa8] sm:$0xff]  ;;  %v839_v14 = vld [vmem:[#allocation2 + $0x20] sm:$0xff]  ;;  %617 = vmatprep.mubr.msk.f32.mxu1 %vm749_vm0, %v750_v61  ;;  %vm220_vm6 = vcmask 458112   ;;  %vm227_vm7 = vcmask 523712   ;;  %vm268_vm8 = vcmask 1041409  }
  0x3b   :  { %87 = vadd.xlane.f32.xlu0 %v86_v7  ;;  %v89_v11 = vadd.f32 %v829_v9, %v827_v8  ;;  %v841_v15 = vld [vmem:[#allocation2 + $0x28] sm:$0xff]  ;;  %v116_v16 = vadd.f32 %v837_v13, %v835_v12  ;;  %v847_v18 = vld [vmem:[#allocation2 + $0xb0] sm:$0xff]  ;;  %v849_v19 = vld [vmem:[#allocation2 + $0xb8] sm:$0xff]  ;;  %vm270_vm9 = vcmask 523264   ;;  %vm349_vm10 = vcmask 1043456   ;;  %s751_s2 = smov [#allocation8]  }
  0x3c   :  { %v92_v17 = vadd.f32 %v841_v15, %v839_v14  ;;  %989 = vst [vmem:[#allocation12_spill] sm:$0xff] %v849_v19  ;;  %v851_v20 = vld [vmem:[#allocation2 + $0x30] sm:$0xff]  ;;  %v853_v21 = vld [vmem:[#allocation2 + $0x38] sm:$0xff]  ;;  %v119_v22 = vadd.f32 %v849_v19, %v847_v18  ;;  %v859_v24 = vld [vmem:[#allocation2 + $0xc0] sm:$0xff]  ;;  %vm345_vm11 = vcmask 31744   ;;  %s568_s23 = sshll.u32 %s751_s2, 4  ;;  %s569_s23 = int_to_ptr.vmem [resolvable:$true] %s568_s23 }
  0x3d   :  { %v95_v23 = vadd.f32 %v853_v21, %v851_v20  ;;  %v861_v25 = vld [vmem:[#allocation2 + $0xc8] sm:$0xff]  ;;  %v863_v26 = vld [vmem:[#allocation2 + $0x40] sm:$0xff]  ;;  %v871_v30 = vld [vmem:[#allocation2 + $0xd0] sm:$0xff]  ;;  %s713_s24 = scalar_lea.vmem %s569_s23, 4096  ;;  %p718_p11 = scmp.lt.s32.totalorder %s569_s23, %s569_s23 }
  0x3e   :  { %114 = vadd.xlane.f32.xlu1 %v113_v10  ;;  %v865_v27 = vld [vmem:[#allocation2 + $0x48] sm:$0xff]  ;;  %v122_v28 = vadd.f32 %v861_v25, %v859_v24  ;;  %990 = vst [vmem:[#allocation13_spill] sm:$0xff] %v871_v30  ;;  %v873_v31 = vld [vmem:[#allocation2 + $0xd8] sm:$0xff]  ;;  %v875_v32 = vld [vmem:[#allocation2 + $0x50] sm:$0xff]  ;;  %v174_v10 = vlaneseq  ;;  %p714_p10 = scmp.ne.s32.totalorder %s569_s23, %s713_s24  ;;  %p719_p12 = scmp.lt.s32.totalorder %s713_s24, %s713_s24 }
  0x3f   :  { %90 = vadd.xlane.f32.xlu0 %v89_v11  ;;  %v98_v29 = vadd.f32 %v865_v27, %v863_v26  ;;  %991 = vst [vmem:[#allocation14_spill] sm:$0xff] %v873_v31  ;;  %v877_v33 = vld [vmem:[#allocation2 + $0x58] sm:$0xff]  ;;  %v125_v34 = vadd.f32 %v873_v31, %v871_v30  ;;  %v883_v36 = vld [vmem:[#allocation2 + $0xe0] sm:$0xff]  ;;  %v885_v37 = vld [vmem:[#allocation2 + $0xe8] sm:$0xff] }
  0x40   :  { %v101_v35 = vadd.f32 %v877_v33, %v875_v32  ;;  %992 = vst [vmem:[#allocation15_spill] sm:$0xff] %v883_v36  ;;  %993 = vst [vmem:[#allocation16_spill] sm:$0xff] %v885_v37  ;;  %v887_v38 = vld [vmem:[#allocation2 + $0x60] sm:$0xff]  ;;  %v889_v39 = vld [vmem:[#allocation2 + $0x68] sm:$0xff]  ;;  %v128_v40 = vadd.f32 %v885_v37, %v883_v36  ;;  %p720_p13 = por %p719_p12, %p718_p11 }
  0x41   :  { %v104_v41 = vadd.f32 %v889_v39, %v887_v38  ;;  %v895_v42 = vld [vmem:[#allocation2 + $0xf0] sm:$0xff]  ;;  %v897_v43 = vld [vmem:[#allocation2 + $0xf8] sm:$0xff]  ;;  %v150_v48 = vld [vmem:[#allocation5] sm:$0xff] }
  0x42   :  { %117 = vadd.xlane.f32.xlu1 %v116_v16  ;;  %994 = vst [vmem:[#allocation17_spill] sm:$0xff] %v895_v42  ;;  %995 = vst [vmem:[#allocation18_spill] sm:$0xff] %v897_v43  ;;  %v899_v44 = vld [vmem:[#allocation2 + $0x70] sm:$0xff]  ;;  %v901_v45 = vld [vmem:[#allocation2 + $0x78] sm:$0xff]  ;;  %v131_v46 = vadd.f32 %v897_v43, %v895_v42  ;;  %p721_p0 = pnand %p720_p13, %p714_p10 }
  0x43   :  { %93 = vadd.xlane.f32.xlu0 %v92_v17  ;;  %v107_v47 = vadd.f32 %v901_v45, %v899_v44  ;;  %v151_v49 = vld [vmem:[#allocation5 + $0x8] sm:$0xff]  ;;  %v152_v52 = vld [vmem:[#allocation5 + $0x10] sm:$0xff]  ;;  %v153_v53 = vld [vmem:[#allocation5 + $0x18] sm:$0xff]  ;;  %v175_v17 = vand.u32 127, %v174_v10 }
  0x44   :  { %v621_v50 = vpack.c.bf16 %v151_v49, %v150_v48  ;;  %v624_v54 = vpack.c.bf16 %v153_v53, %v152_v52  ;;  %v154_v55 = vld [vmem:[#allocation5 + $0x20] sm:$0xff]  ;;  %v155_v56 = vld [vmem:[#allocation5 + $0x28] sm:$0xff]  ;;  %v156_v58 = vld [vmem:[#allocation5 + $0x30] sm:$0xff] }
  0x45   :  { %v627_v57 = vpack.c.bf16 %v155_v56, %v154_v55  ;;  %v157_v59 = vld [vmem:[#allocation5 + $0x38] sm:$0xff] }
  0x46   :  { %120 = vadd.xlane.f32.xlu1 %v119_v22  ;;  %622 = vmatpush3.bf16.msra.mxu0 %v621_v50  ;;  %v630_v60 = vpack.c.bf16 %v157_v59, %v156_v58 }
  0x47   :  { %96 = vadd.xlane.f32.xlu0 %v95_v23  ;;  %623 = vmatprep.subr.bf16.mxu0 %v748_v51  ;;  %v907_v23 = vshrl.u32 %v174_v10, 7 }
  0x4a   :  { %123 = vadd.xlane.f32.xlu1 %v122_v28  ;;  %625 = vmatpush3.bf16.msra.mxu0 %v624_v54 }
  0x4b   :  { %99 = vadd.xlane.f32.xlu0 %v98_v29  ;;  %626 = vmatprep.subr.bf16.mxu0 %v748_v51  ;;  %v180_v29 = vadd.s32 4294967288, %v175_v17 }
  0x4d   :  { %v183_v49 = vsub.s32 %v180_v29, %v907_v23 }
  0x4e   :  { %126 = vadd.xlane.f32.xlu1 %v125_v34  ;;  %628 = vmatpush3.bf16.msra.mxu0 %v627_v57  ;;  %v187_v34 = vadd.s32 4294967280, %v175_v17 }
  0x4f   :  { %102 = vadd.xlane.f32.xlu0 %v101_v35  ;;  %629 = vmatprep.subr.bf16.mxu0 %v748_v51  ;;  %v194_v35 = vadd.s32 4294967272, %v175_v17  ;;  %v215_v51 = vadd.s32 4294967248, %v175_v17 }
  0x50   :  { %v190_v50 = vsub.s32 %v187_v34, %v907_v23 }
  0x51   :  { %v197_v53 = vsub.s32 %v194_v35, %v907_v23 }
  0x52   :  { %129 = vadd.xlane.f32.xlu1 %v128_v40  ;;  %631 = vmatpush3.bf16.msra.mxu0 %v630_v60  ;;  %v201_v40 = vadd.s32 4294967264, %v175_v17 }
  0x53   :  { %105 = vadd.xlane.f32.xlu0 %v104_v41 }
  0x54   :  { %v204_v54 = vsub.s32 %v201_v40, %v907_v23  ;;  %v222_v40 = vadd.s32 4294967240, %v175_v17 }
  0x56   :  { %132 = vadd.xlane.f32.xlu1 %v131_v46  ;;  %v208_v46 = vadd.s32 4294967256, %v175_v17 }
  0x57   :  { %108 = vadd.xlane.f32.xlu0 %v107_v47  ;;  %v178_v47 = vsub.s32 %v175_v17, %v907_v23  ;;  %v225_v17 = vsub.s32 %v222_v40, %v907_v23 }
  0x58   :  { %v211_v57 = vsub.s32 %v208_v46, %v907_v23 }
  0xc7   :  { %v112_v62 = vpop.xlane.xlu1 %111 }
  0xc8   :  { %v88_v63 = vpop.xlane.xlu0 %87  ;;  %v142_v59 = vmul.f32 0.00390625, %v112_v62 }
  0xc9   :  { %v134_v29 = vmul.f32 0.00390625, %v88_v63 }
  0xca   :  { %v232_v37 = vrot.slane %v142_v59, %v178_v47 }
  0xcb   :  { %v115_v3 = vpop.xlane.xlu1 %114  ;;  %v179_v19 = vrot.slane %v134_v29, %v178_v47 }
  0xcc   :  { %v91_v7 = vpop.xlane.xlu0 %90  ;;  %v143_v52 = vmul.f32 0.00390625, %v115_v3  ;;  %v218_v3 = vsub.s32 %v215_v51, %v907_v23 }
  0xcd   :  { %v135_v55 = vmul.f32 0.00390625, %v91_v7 }
  0xce   :  { %v236_v35 = vrot.slane %v143_v52, %v183_v49 }
  0xcf   :  { %v118_v11 = vpop.xlane.xlu1 %117  ;;  %v184_v7 = vrot.slane %v135_v55, %v183_v49 }
  0xd0   :  { %v94_v16 = vpop.xlane.xlu0 %93  ;;  %v144_v56 = vmul.f32 0.00390625, %v118_v11  ;;  %v237_v51 = vsel %vm185_vm1, %v236_v35, %v232_v37  ;;  %v344_v35 = vld [vmem:[#allocation7] sm:$0xf] }
  0xd1   :  { %v136_v60 = vmul.f32 0.00390625, %v94_v16  ;;  %v186_v49 = vsel %vm185_vm1, %v184_v7, %v179_v19  ;;  %616 = vmatpush3.msk.msra.mxu1 %vm349_vm10, %v344_v35 }
  0xd2   :  { %v241_v11 = vrot.slane %v144_v56, %v190_v50 }
  0xd3   :  { %v121_v22 = vpop.xlane.xlu1 %120  ;;  %v191_v62 = vrot.slane %v136_v60, %v190_v50 }
  0xd4   :  { %v97_v28 = vpop.xlane.xlu0 %96  ;;  %v145_v61 = vmul.f32 0.00390625, %v121_v22  ;;  %v242_v55 = vsel %vm192_vm2, %v241_v11, %v237_v51 }
  0xd5   :  { %v137_v34 = vmul.f32 0.00390625, %v97_v28  ;;  %v193_v59 = vsel %vm192_vm2, %v191_v62, %v186_v49 }
  0xd6   :  { %v246_v16 = vrot.slane %v145_v61, %v197_v53 }
  0xd7   :  { %v124_v41 = vpop.xlane.xlu1 %123  ;;  %v198_v63 = vrot.slane %v137_v34, %v197_v53 }
  0xd8   :  { %v100_v48 = vpop.xlane.xlu0 %99  ;;  %v146_v43 = vmul.f32 0.00390625, %v124_v41  ;;  %v247_v47 = vsel %vm199_vm3, %v246_v16, %v242_v55 }
  0xd9   :  { %v138_v42 = vmul.f32 0.00390625, %v100_v48  ;;  %v200_v37 = vsel %vm199_vm3, %v198_v63, %v193_v59 }
  0xda   :  { %v251_v28 = vrot.slane %v146_v43, %v204_v54 }
  0xdb   :  { %v127_v58 = vpop.xlane.xlu1 %126  ;;  %v205_v52 = vrot.slane %v138_v42, %v204_v54 }
  0xdc   :  { %v103_v10 = vpop.xlane.xlu0 %102  ;;  %v147_v31 = vmul.f32 0.00390625, %v127_v58 }
  0xdd   :  { %v139_v30 = vmul.f32 0.00390625, %v103_v10  ;;  %v207_v19 = vsel %vm206_vm4, %v205_v52, %v200_v37  ;;  %v466_v52 = vsub.s32 1, %v907_v23 }
  0xde   :  { %v256_v48 = vrot.slane %v147_v31, %v211_v57  ;;  %v252_v31 = vsel %vm206_vm4, %v251_v28, %v247_v47  ;;  %v431_v28 = vsub.s32 0, %v907_v23 }
  0xdf   :  { %v130_v46 = vpop.xlane.xlu1 %129  ;;  %v212_v56 = vrot.slane %v139_v30, %v211_v57 }
  0xe0   :  { %v148_v22 = vmul.f32 0.00390625, %v130_v46  ;;  %v106_v36 = vpop.xlane.xlu0 %105  ;;  %v257_v54 = vsel %vm213_vm5, %v256_v48, %v252_v31 }
  0xe1   :  { %v140_v41 = vmul.f32 0.00390625, %v106_v36  ;;  %v214_v57 = vsel %vm213_vm5, %v212_v56, %v207_v19 }
  0xe2   :  { %v261_v58 = vrot.slane %v148_v22, %v218_v3 }
  0xe3   :  { %v133_v50 = vpop.xlane.xlu1 %132  ;;  %v219_v53 = vrot.slane %v140_v41, %v218_v3 }
  0xe4   :  { %v149_v43 = vmul.f32 0.00390625, %v133_v50  ;;  %v109_v36 = vpop.xlane.xlu0 %108  ;;  %v262_v60 = vsel %vm220_vm6, %v261_v58, %v257_v54 }
  0xe5   :  { %v141_v42 = vmul.f32 0.00390625, %v109_v36  ;;  %v221_v10 = vsel %vm220_vm6, %v219_v53, %v214_v57 }
  0xe6   :  { %v266_v30 = vrot.slane %v149_v43, %v225_v17 }
  0xe7   :  { %v226_v61 = vrot.slane %v141_v42, %v225_v17 }
  0xe8   :  { %v267_v29 = vsel %vm227_vm7, %v266_v30, %v262_v60  ;;  %v996_v60 = vld [vmem:[#allocation12_spill] sm:$0xff] }
  0xe9   :  { %v228_v34 = vsel %vm227_vm7, %v226_v61, %v221_v10  ;;  %v997_v10 = vld [vmem:[#allocation15_spill] sm:$0xff] }
  0xea   :  { %v269_v3 = vsel %vm268_vm8, %v267_v29, %v228_v34  ;;  %v998_v34 = vld [vmem:[#allocation16_spill] sm:$0xff] }
  0xeb   :  { %613 = vmatmul.mubr.msk.f32.vlgmr.msra.gmra.mrb[0].mxu0 %vm270_vm9, %v269_v3  ;;  %v1000_v3 = vld [vmem:[#allocation14_spill] sm:$0xff] }
 0x1be   :  { %v339_v40 = vpop.f32.mrb[0].mxu0 }
 0x1bf   :  { %v343_v7 = vmax.f32 %v339_v40, 0.0  ;;  %v614_v11 = vpop.f32.mrb[1].mxu0  ;;  %v1001_v40 = vld [vmem:[#allocation17_spill] sm:$0xff] }
 0x1c0   :  { %v1002_v11 = vld [vmem:[#allocation18_spill] sm:$0xff] }
 0x1c1   :  { %618 = vmatmul.mubr.msk.f32.vlgmr.msra.gmra.mrb[0].mxu1 %vm345_vm11, %v343_v7 }
 0x294   :  { %v419_v46 = vpop.f32.mrb[0].mxu1 }
 0x295   :  { %v584_v62 = vmul.f32 -1.442695, %v419_v46  ;;  %v619_v16 = vpop.f32.mrb[1].mxu1 }
 0x297   :  { %643 = vpow2.f32 %v584_v62 }
 0x2a1   :  { %v644_v22 = vpop.eup %643 }
 0x2a2   :  { %v426_v63 = vadd.f32 1.0, %v644_v22 }
 0x2a4   :  { %645 = vrcp.f32 %v426_v63 }
 0x2ae   :  { %v646_v41 = vpop.eup %645 }
 0x2af   :  { %v432_v51 = vrot.slane %v646_v41, %v431_v28  ;;  %v467_v48 = vrot.slane %v646_v41, %v466_v52 }
 0x2b1   :  { %438 = vbcast.lane.b32.xlu1 %v432_v51, 264  ;;  %434 = vbcast.lane.b32.xlu0 %v432_v51, 256 }
 0x2b5   :  { %442 = vbcast.lane.b32.xlu1 %v432_v51, 272  ;;  %450 = vbcast.lane.b32.xlu0 %v432_v51, 288 }
 0x2b9   :  { %446 = vbcast.lane.b32.xlu1 %v432_v51, 280  ;;  %458 = vbcast.lane.b32.xlu0 %v432_v51, 304 }
 0x2bd   :  { %454 = vbcast.lane.b32.xlu1 %v432_v51, 296  ;;  %469 = vbcast.lane.b32.xlu0 %v467_v48, 256 }
 0x2c1   :  { %462 = vbcast.lane.b32.xlu1 %v432_v51, 312  ;;  %477 = vbcast.lane.b32.xlu0 %v467_v48, 272 }
 0x2c5   :  { %473 = vbcast.lane.b32.xlu1 %v467_v48, 264  ;;  %485 = vbcast.lane.b32.xlu0 %v467_v48, 288 }
 0x2c9   :  { %481 = vbcast.lane.b32.xlu1 %v467_v48, 280  ;;  %493 = vbcast.lane.b32.xlu0 %v467_v48, 304 }
 0x2cd   :  { %489 = vbcast.lane.b32.xlu1 %v467_v48, 296 }
 0x2d1   :  { %497 = vbcast.lane.b32.xlu1 %v467_v48, 312 }
 0x323   :  { %v439_v17 = vpop.permute.xlu1 %438  ;;  %v435_v49 = vpop.permute.xlu0 %434 }
 0x324   :  { %v501_v55 = vmul.f32 %v439_v17, %v827_v8  ;;  %v502_v56 = vmul.f32 %v439_v17, %v829_v9  ;;  %v499_v23 = vmul.f32 %v435_v49, %v815_v2  ;;  %v500_v58 = vmul.f32 %v435_v49, %v819_v4 }
 0x326   :  { %533 = vst [vmem:[#allocation8 + $0x10] sm:$0xff] %v501_v55  ;;  %534 = vst [vmem:[#allocation8 + $0x18] sm:$0xff] %v502_v56 }
 0x327   :  { %531 = vst [vmem:[#allocation8] sm:$0xff] %v499_v23  ;;  %532 = vst [vmem:[#allocation8 + $0x8] sm:$0xff] %v500_v58  ;;  %v443_v50 = vpop.permute.xlu1 %442  ;;  %v451_v59 = vpop.permute.xlu0 %450 }
 0x328   :  { %v503_v47 = vmul.f32 %v443_v50, %v839_v14  ;;  %v504_v53 = vmul.f32 %v443_v50, %v841_v15  ;;  %v507_v43 = vmul.f32 %v451_v59, %v863_v26  ;;  %v508_v8 = vmul.f32 %v451_v59, %v865_v27 }
 0x32a   :  { %535 = vst [vmem:[#allocation8 + $0x20] sm:$0xff] %v503_v47  ;;  %536 = vst [vmem:[#allocation8 + $0x28] sm:$0xff] %v504_v53 }
 0x32b   :  { %539 = vst [vmem:[#allocation8 + $0x40] sm:$0xff] %v507_v43  ;;  %540 = vst [vmem:[#allocation8 + $0x48] sm:$0xff] %v508_v8  ;;  %v447_v2 = vpop.permute.xlu1 %446  ;;  %v459_v4 = vpop.permute.xlu0 %458 }
 0x32c   :  { %v505_v9 = vmul.f32 %v447_v2, %v851_v20  ;;  %v506_v36 = vmul.f32 %v447_v2, %v853_v21  ;;  %v511_v37 = vmul.f32 %v459_v4, %v887_v38  ;;  %v512_v14 = vmul.f32 %v459_v4, %v889_v39 }
 0x32e   :  { %537 = vst [vmem:[#allocation8 + $0x30] sm:$0xff] %v505_v9  ;;  %538 = vst [vmem:[#allocation8 + $0x38] sm:$0xff] %v506_v36 }
 0x32f   :  { %543 = vst [vmem:[#allocation8 + $0x60] sm:$0xff] %v511_v37  ;;  %544 = vst [vmem:[#allocation8 + $0x68] sm:$0xff] %v512_v14  ;;  %v455_v15 = vpop.permute.xlu1 %454  ;;  %v470_v26 = vpop.permute.xlu0 %469 }
 0x330   :  { %v509_v27 = vmul.f32 %v455_v15, %v875_v32  ;;  %v510_v31 = vmul.f32 %v455_v15, %v877_v33  ;;  %v515_v42 = vmul.f32 %v470_v26, %v811_v0  ;;  %v516_v20 = vmul.f32 %v470_v26, %v813_v1 }
 0x332   :  { %541 = vst [vmem:[#allocation8 + $0x50] sm:$0xff] %v509_v27  ;;  %542 = vst [vmem:[#allocation8 + $0x58] sm:$0xff] %v510_v31 }
 0x333   :  { %547 = vst [vmem:[#allocation8 + $0x80] sm:$0xff] %v515_v42  ;;  %548 = vst [vmem:[#allocation8 + $0x88] sm:$0xff] %v516_v20  ;;  %v463_v21 = vpop.permute.xlu1 %462  ;;  %v478_v38 = vpop.permute.xlu0 %477 }
 0x334   :  { %v513_v39 = vmul.f32 %v463_v21, %v899_v44  ;;  %v514_v19 = vmul.f32 %v463_v21, %v901_v45  ;;  %v519_v54 = vmul.f32 %v478_v38, %v835_v12  ;;  %v520_v32 = vmul.f32 %v478_v38, %v837_v13 }
 0x336   :  { %545 = vst [vmem:[#allocation8 + $0x70] sm:$0xff] %v513_v39  ;;  %546 = vst [vmem:[#allocation8 + $0x78] sm:$0xff] %v514_v19 }
 0x337   :  { %551 = vst [vmem:[#allocation8 + $0xa0] sm:$0xff] %v519_v54  ;;  %552 = vst [vmem:[#allocation8 + $0xa8] sm:$0xff] %v520_v32  ;;  %v474_v0 = vpop.permute.xlu1 %473  ;;  %v486_v1 = vpop.permute.xlu0 %485 }
 0x338   :  { %v517_v33 = vmul.f32 %v474_v0, %v821_v5  ;;  %v518_v30 = vmul.f32 %v474_v0, %v823_v6  ;;  %v523_v57 = vmul.f32 %v486_v1, %v859_v24  ;;  %v524_v44 = vmul.f32 %v486_v1, %v861_v25  ;;  %v999_v24 = vld [vmem:[#allocation13_spill] sm:$0xff] }
 0x33a   :  { %549 = vst [vmem:[#allocation8 + $0x90] sm:$0xff] %v517_v33  ;;  %550 = vst [vmem:[#allocation8 + $0x98] sm:$0xff] %v518_v30 }
 0x33b   :  { %555 = vst [vmem:[#allocation8 + $0xc0] sm:$0xff] %v523_v57  ;;  %556 = vst [vmem:[#allocation8 + $0xc8] sm:$0xff] %v524_v44  ;;  %v482_v12 = vpop.permute.xlu1 %481  ;;  %v494_v13 = vpop.permute.xlu0 %493 }
 0x33c   :  { %v521_v45 = vmul.f32 %v482_v12, %v847_v18  ;;  %v522_v61 = vmul.f32 %v482_v12, %v996_v60  ;;  %v527_v29 = vmul.f32 %v494_v13, %v997_v10  ;;  %v528_v5 = vmul.f32 %v494_v13, %v998_v34 }
 0x33e   :  { %553 = vst [vmem:[#allocation8 + $0xb0] sm:$0xff] %v521_v45  ;;  %554 = vst [vmem:[#allocation8 + $0xb8] sm:$0xff] %v522_v61 }
 0x33f   :  { %559 = vst [vmem:[#allocation8 + $0xe0] sm:$0xff] %v527_v29  ;;  %560 = vst [vmem:[#allocation8 + $0xe8] sm:$0xff] %v528_v5  ;;  %v490_v6 = vpop.permute.xlu1 %489 }
 0x340   :  { %v525_v25 = vmul.f32 %v490_v6, %v999_v24  ;;  %v526_v35 = vmul.f32 %v490_v6, %v1000_v3 }
 0x342   :  { %557 = vst [vmem:[#allocation8 + $0xd0] sm:$0xff] %v525_v25  ;;  %558 = vst [vmem:[#allocation8 + $0xd8] sm:$0xff] %v526_v35 }
 0x343   :  { %v498_v18 = vpop.permute.xlu1 %497 }
 0x344   :  { %v529_v7 = vmul.f32 %v498_v18, %v1001_v40  ;;  %v530_v46 = vmul.f32 %v498_v18, %v1002_v11 }
 0x346   :  { %561 = vst [vmem:[#allocation8 + $0xf0] sm:$0xff] %v529_v7  ;;  %562 = vst [vmem:[#allocation8 + $0xf8] sm:$0xff] %v530_v46 }
 0x347   :  { %724 = shalt.err (!%p721_p0)
}
 0x348   :  { %s725_s27 = scalar_lea.hbm %s981_s3, 4096 }
 0x349   :  { %p726_p1 = scmp.ne.s32.totalorder %s981_s3, %s725_s27  ;;  %p729_p2 = scmp.lt.u32.totalorder %s725_s27, %s981_s3 }
 0x34b   :  { %p731_p3 = pnand %p729_p2, %p726_p1 }
 0x34d   :  { %734 = shalt.err (!%p731_p3)
}
 0x34e   :  { %574 = dma.vmem_to_hbm [thread:$0]  %s569_s23, 4096, %s981_s3, [#allocation4], %s745_s1, %s745_s1, %s746_s9  }
 0x34f   :  { %739 = dma.done.wait [#allocation4], 4096  }
 0x350   :  { %740 = vsyncadd [#allocation4], 4294963200 }
 0x351   :  { %578 = vsyncpa [#allocation3], 1 }
 0x352   :  { %579 = vsyncpa [#allocation6], 1 }
 0x353   :  { %580 = vsyncpa [#allocation4], 1 }

</bundles_post_ra>
